<compile_context>
chip_gen: v5e
topology: v5e:2x2
jax: 0.10.0
libtpu: 0.0.40
codegen_flags: <defaults>
</compile_context>

<pallas_src>
import jax
import jax.numpy as jnp
import numpy as np
from jax.experimental import pallas as pl
from jax.experimental.pallas import tpu as pltpu

_TARGET_BLOCK_ELEMS = 512 * 1024  # ~2 MiB of f32 per block


def _exp_fwd_kernel(params_ref, t_ref, o_ref):
    # params_ref (SMEM, f32[6]): [log_base, offset, scale, intercept, cut, slope]
    log_base = params_ref[0]
    offset = params_ref[1]
    scale = params_ref[2]
    intercept = params_ref[3]
    cut = params_ref[4]
    slope = params_ref[5]

    t = t_ref[...]
    pow_value = scale * jnp.exp(t * log_base) + offset   # scale * base**t + offset
    lin_value = slope * t + intercept
    # (t > cut) ? pow : lin  -- matches torch: interp*pow + (1-interp)*lin
    o_ref[...] = jnp.where(t > cut, pow_value, lin_value)


def _pick_lanes(n):
    for cand in (2048, 1024, 512, 256, 128):
        if n % cand == 0:
            return cand, False
    return 512, True  # needs tail padding


def _pick_block_rows(rows, lanes):
    target_rows = max(8, (_TARGET_BLOCK_ELEMS // lanes) // 8 * 8)
    if rows <= target_rows:
        return rows  # single row-block == full array dim (no (8,128) issue)
    # prefer a multiple of 8 that divides rows exactly (no edge masking)
    for br in range(target_rows, 7, -8):
        if rows % br == 0:
            return br
    # fall back to cdiv grid; Pallas masks the partial edge block
    return target_rows


def exp_function_simplified_forward(t, log10_base, offset, scale, intercept, cut):
    """t: f32 array of any shape (e.g. NCHW).  Scalars mirror the module params.

    Note: the module's `slope` parameter is unused by forward(); slope is
    recomputed from the other parameters (as in compute_intermediate_values).
    """
    # ---- scalar precompute hoisted out of the kernel (free EUP inside) ----
    log10_base = jnp.asarray(log10_base, jnp.float32)
    offset = jnp.asarray(offset, jnp.float32)
    scale = jnp.asarray(scale, jnp.float32)
    intercept = jnp.asarray(intercept, jnp.float32)
    cut = jnp.asarray(cut, jnp.float32)

    log_base = log10_base * jnp.log(jnp.float32(10.0))           # ln(base)
    slope = (scale * jnp.exp(cut * log_base) + offset - intercept) / jnp.abs(cut)
    params = jnp.stack([log_base, offset, scale, intercept, cut, slope]).astype(
        jnp.float32
    )

    orig_shape = t.shape
    flat = t.reshape(-1)
    n = flat.shape[0]

    # ---- lane-dense slab layout ----
    lanes, needs_pad = _pick_lanes(n)
    n_pad = -(-n // lanes) * lanes
    if needs_pad and n_pad != n:
        flat = jnp.concatenate([flat, jnp.zeros((n_pad - n,), flat.dtype)])
    rows = n_pad // lanes
    slab = flat.reshape(rows, lanes)

    block_rows = _pick_block_rows(rows, lanes)
    grid = (pl.cdiv(rows, block_rows),)

    out = pl.pallas_call(
        _exp_fwd_kernel,
        out_shape=jax.ShapeDtypeStruct((rows, lanes), t.dtype),
        grid_spec=pltpu.PrefetchScalarGridSpec(
            num_scalar_prefetch=1,
            grid=grid,
            in_specs=[
                pl.BlockSpec((block_rows, lanes), lambda i, p: (i, 0)),
            ],
            out_specs=pl.BlockSpec((block_rows, lanes), lambda i, p: (i, 0)),
        ),
        compiler_params=pltpu.CompilerParams(
            dimension_semantics=("parallel",),  # shards grid across TCs on v7x
        ),
    )(params, slab)

    out_flat = out.reshape(-1)
    if n_pad != n:
        out_flat = out_flat[:n]
    return out_flat.reshape(orig_shape)


def exp_function_simplified_reference(t, log10_base, offset, scale, intercept, cut):
    """Pure-JAX reference mirroring the PyTorch forward()."""
    base = jnp.power(jnp.float32(10.0), log10_base)
    slope = (scale * jnp.power(base, cut) + offset - intercept) / jnp.abs(cut)
    interp = (t > cut).astype(t.dtype)
    pow_value = scale * jnp.power(base, t) + offset
    lin_value = slope * t + intercept
    return interp * pow_value + (1.0 - interp) * lin_value


if __name__ == "__main__":
    # Deterministic parameters (mirrors exp_parameters_simplified init).
    base_init = 2.0
    offset_init = -0.1
    scale_init = 0.5
    intercept_init = 0.05
    cut_init = 0.25
    log10_base_init = float(np.log10(base_init))  # module stores log10(base)

    key = jax.random.PRNGKey(0)
    x = jax.random.uniform(key, (2, 4, 16, 16), dtype=jnp.float32)  # NCHW

    y = exp_function_simplified_forward(
        x, log10_base_init, offset_init, scale_init, intercept_init, cut_init
    )
    y = jax.block_until_ready(y)

    y_ref = exp_function_simplified_reference(
        x, log10_base_init, offset_init, scale_init, intercept_init, cut_init
    )
    np.testing.assert_allclose(np.asarray(y), np.asarray(y_ref), rtol=1e-5, atol=1e-5)

    # Exercise the padded (non-multiple-of-128) path on a tiny tensor.
    x2 = jax.random.normal(jax.random.PRNGKey(1), (3, 5, 7), dtype=jnp.float32)
    y2 = jax.block_until_ready(
        exp_function_simplified_forward(
            x2, log10_base_init, offset_init, scale_init, intercept_init, cut_init
        )
    )
    y2_ref = exp_function_simplified_reference(
        x2, log10_base_init, offset_init, scale_init, intercept_init, cut_init
    )
    np.testing.assert_allclose(np.asarray(y2), np.asarray(y2_ref), rtol=1e-5, atol=1e-5)

    print("KERNEL_OK")
</pallas_src>

<mosaic_0001>
module attributes {stable_mosaic.version = 11 : i64} {
  func.func @_exp_fwd_kernel(%arg0: i32, %arg1: memref<6xf32, #tpu.memory_space<smem>>, %arg2: memref<1x2048xf32, #tpu.memory_space<vmem>>, %arg3: memref<1x2048xf32, #tpu.memory_space<vmem>>) attributes {dimension_semantics = [#tpu.dimension_semantics<parallel>], iteration_bounds = array<i64: 1>, scalar_prefetch = 1 : i64, scratch_operands = 0 : i64, tpu.core_type = #tpu.core_type<tc>, window_params = [{transform_indices = @transform_0, window_bounds = array<i64: 1, 2048>}, {transform_indices = @transform_1, window_bounds = array<i64: 1, 2048>}]} {
    %c0 = arith.constant 0 : index
    %0 = memref.load %arg1[%c0] : memref<6xf32, #tpu.memory_space<smem>>
    %c1 = arith.constant 1 : index
    %1 = memref.load %arg1[%c1] : memref<6xf32, #tpu.memory_space<smem>>
    %c2 = arith.constant 2 : index
    %2 = memref.load %arg1[%c2] : memref<6xf32, #tpu.memory_space<smem>>
    %c3 = arith.constant 3 : index
    %3 = memref.load %arg1[%c3] : memref<6xf32, #tpu.memory_space<smem>>
    %c4 = arith.constant 4 : index
    %4 = memref.load %arg1[%c4] : memref<6xf32, #tpu.memory_space<smem>>
    %c5 = arith.constant 5 : index
    %5 = memref.load %arg1[%c5] : memref<6xf32, #tpu.memory_space<smem>>
    %c0_0 = arith.constant 0 : index
    %c0_1 = arith.constant 0 : index
    %6 = vector.load %arg2[%c0_0, %c0_1] : memref<1x2048xf32, #tpu.memory_space<vmem>>, vector<1x2048xf32>
    %7 = vector.broadcast %0 : f32 to vector<1x2048xf32>
    %8 = arith.mulf %6, %7 : vector<1x2048xf32>
    %9 = math.exp %8 : vector<1x2048xf32>
    %10 = vector.broadcast %2 : f32 to vector<1x2048xf32>
    %11 = arith.mulf %10, %9 : vector<1x2048xf32>
    %12 = vector.broadcast %1 : f32 to vector<1x2048xf32>
    %13 = arith.addf %11, %12 : vector<1x2048xf32>
    %14 = vector.broadcast %5 : f32 to vector<1x2048xf32>
    %15 = arith.mulf %14, %6 : vector<1x2048xf32>
    %16 = vector.broadcast %3 : f32 to vector<1x2048xf32>
    %17 = arith.addf %15, %16 : vector<1x2048xf32>
    %18 = vector.broadcast %4 : f32 to vector<1x2048xf32>
    %19 = arith.cmpf ogt, %6, %18 : vector<1x2048xf32>
    %20 = arith.select %19, %13, %17 : vector<1x2048xi1>, vector<1x2048xf32>
    %c0_2 = arith.constant 0 : index
    %c0_3 = arith.constant 0 : index
    %21 = vector.load %arg3[%c0_2, %c0_3] : memref<1x2048xf32, #tpu.memory_space<vmem>>, vector<1x2048xf32>
    tpu.vector_store %arg3[%c0_2, %c0_3], %20 {strides = array<i32>} : memref<1x2048xf32, #tpu.memory_space<vmem>>, vector<1x2048xf32>,
    return
  }
  func.func @transform_0(%arg0: i32, %arg1: memref<6xf32, #tpu.memory_space<smem>>) -> (i32, i32) {
    %c0_i32 = arith.constant 0 : i32
    %c0_i32_0 = arith.constant 0 : i32
    return %arg0, %c0_i32 : i32, i32
  }
  func.func @transform_1(%arg0: i32, %arg1: memref<6xf32, #tpu.memory_space<smem>>) -> (i32, i32) {
    %c0_i32 = arith.constant 0 : i32
    %c0_i32_0 = arith.constant 0 : i32
    return %arg0, %c0_i32 : i32, i32
  }
}

</mosaic_0001>

<bundles_post_ra>
// kernel: tpu_custom_call.1
= control target key start
LH: loop header
LB: loop body
LE: loop exit
PB: predicated region body
PF: predicated region fallthrough
CT: control target
= control target key end

     0   :  { %s161_s12 = smov [#allocation3]   ;;  %s188_s0 = inlined_call_operand.hbm [shape: f32[6], index: 0, kind: input, shape index: {}]   ;;  %s189_s1 = inlined_call_operand.hbm [shape: f32[1,2048], index: 1, kind: input, shape index: {}]   ;;  %s190_s2 = inlined_call_operand.hbm [shape: f32[1,2048], index: 2, kind: output, shape index: {}]  }
   0x1   :  { %s8_s11 = sshll.u32 %s188_s0, 4  ;;  %s9_s11 = int_to_ptr.hbm [resolvable:$true] %s8_s11 }
   0x2   :  { %11 = dma.hbm_to_smem %s9_s11, 16, %s161_s12, [#allocation2] }
   0x3   :  { %155 = dma.done.wait [#allocation2], 16 }
   0x4   :  { %156 = vsyncadd [#allocation2], 4294967280 }
   0x5   :  { %14 = sfence }
   0x6   :  { %15 = vsyncpa [#allocation5], 0 }
   0x7   :  { %16 = vsyncpa [#allocation6], 0  ;;  %s22_s15 = sshll.u32 %s189_s1, 4  ;;  %s162_s16 = smov [#allocation4]   ;;  %s23_s15 = int_to_ptr.hbm [resolvable:$true] %s22_s15 }
   0x8   :  { %s24_s17 = sshll.u32 %s162_s16, 4  ;;  %s25_s17 = int_to_ptr.vmem [resolvable:$true] %s24_s17 }
   0x9   :  { %27 = dma.hbm_to_vmem [thread:$0]  %s23_s15, 256, %s25_s17, [#allocation5]  }
   0xa   :  { %157 = dma.done.wait [#allocation5], 256  }
   0xb   :  { %158 = vsyncadd [#allocation5], 4294967040  ;;  %s32_s0 = sld [smem:[#allocation3]]  ;;  %v38_v0 = vld [vmem:[#allocation4] sm:$0xff]  ;;  %v39_v2 = vld [vmem:[#allocation4 + $0x8] sm:$0xff]  ;;  %s163_s1 = smov [#allocation7]  }
   0xc   :  { %s87_s18 = sld [smem:[#allocation3 + $0x5]]  ;;  %s71_s23 = sshll.u32 %s163_s1, 4  ;;  %s72_s23 = int_to_ptr.vmem [resolvable:$true] %s71_s23 }
   0xd   :  { %s84_s19 = sld [smem:[#allocation3 + $0x2]]  ;;  %s73_s26 = sshll.u32 %s190_s2, 4  ;;  %s74_s26 = int_to_ptr.hbm [resolvable:$true] %s73_s26 }
   0xe   :  { %s85_s20 = sld [smem:[#allocation3 + $0x3]] }
   0xf   :  { %s86_s21 = sld [smem:[#allocation3 + $0x4]] }
  0x10   :  { %s83_s22 = sld [smem:[#allocation3 + $0x1]] }
  0x11   :  { %v40_v1 = vstv %s32_s0 }
  0x12   :  { %v41_v3 = vmul.f32 %v40_v1, %v38_v0  ;;  %v42_v4 = vmul.f32 %v40_v1, %v39_v2  ;;  %v53_v7 = vstv %s87_s18 }
  0x13   :  { %v54_v8 = vmul.f32 %v53_v7, %v38_v0  ;;  %v47_v9 = vstv %s84_s19  ;;  %v55_v11 = vmul.f32 %v53_v7, %v39_v2 }
  0x14   :  { %v43_v5 = vmul.f32 1.442695, %v41_v3  ;;  %v45_v6 = vmul.f32 1.442695, %v42_v4  ;;  %v56_v10 = vstv %s85_s20 }
  0x15   :  { %v59_v12 = vstv %s86_s21  ;;  %v57_v17 = vadd.f32 %v56_v10, %v54_v8  ;;  %v58_v19 = vadd.f32 %v56_v10, %v55_v11 }
  0x16   :  { %91 = vpow2.f32 %v43_v5  ;;  %v50_v14 = vstv %s83_s22  ;;  %vm60_vm0 = vcmp.gt.f32.partialorder %v38_v0, %v59_v12  ;;  %vm61_vm1 = vcmp.gt.f32.partialorder %v39_v2, %v59_v12 }
  0x17   :  { %93 = vpow2.f32 %v45_v6 }
  0x1c   :  { %v92_v13 = vpop.eup %91 }
  0x1d   :  { %v94_v15 = vpop.eup %93  ;;  %v48_v16 = vmul.f32 %v92_v13, %v47_v9 }
  0x1e   :  { %v49_v18 = vmul.f32 %v94_v15, %v47_v9 }
  0x1f   :  { %v51_v20 = vadd.f32 %v50_v14, %v48_v16 }
  0x20   :  { %v52_v21 = vadd.f32 %v50_v14, %v49_v18 }
  0x21   :  { %v62_v22 = vsel %vm60_vm0, %v51_v20, %v57_v17 }
  0x22   :  { %64 = vst [vmem:[#allocation7] sm:$0xff] %v62_v22  ;;  %v63_v23 = vsel %vm61_vm1, %v52_v21, %v58_v19 }
  0x23   :  { %65 = vst [vmem:[#allocation7 + $0x8] sm:$0xff] %v63_v23 }
  0x24   :  { %76 = dma.vmem_to_hbm [thread:$0]  %s72_s23, 256, %s74_s26, [#allocation6]  }
  0x25   :  { %159 = dma.done.wait [#allocation6], 256  }
  0x26   :  { %160 = vsyncadd [#allocation6], 4294967040 }
  0x27   :  { %81 = vsyncpa [#allocation5], 1 }
  0x28   :  { %82 = vsyncpa [#allocation6], 1 }

</bundles_post_ra>
